<compile_context>
chip_gen: v5e
topology: v5e:2x2
jax: 0.10.0
libtpu: 0.0.40
codegen_flags: <defaults>
</compile_context>

<pallas_src>
import functools

import jax
import jax.numpy as jnp
import numpy as np
from jax import lax
from jax.experimental import pallas as pl
from jax.experimental.pallas import tpu as pltpu


def _round_up(x, m):
    return (x + m - 1) // m * m


def _pick_tile_h(H, W, Cin, Cout, K9, budget_bytes=8 * 1024 * 1024):
    """Largest divisor of H whose per-grid-step working set fits a VMEM budget."""
    Wp = W + 2
    best = 1
    for t in range(1, H + 1):
        if H % t:
            continue
        L = t * Wp
        Pt_pad = _round_up((t + 2) * Wp + 2, 128)
        step = 4 * (2 * Cin * Pt_pad        # input tile (double buffered)
                    + 2 * 2 * Cout * L      # y tile + out tile (double buffered)
                    + K9 * L                # in-kernel patch temporary
                    + Cout * L)             # matmul result
        if step <= budget_bytes:
            best = t
    return best


def _conv_stats_kernel(xf_ref, w2_ref, mask_ref, y_ref, sum_ref, sumsq_ref, *,
                       shifts, L, compute_dtype):
    """Phase 1: conv (single folded contraction) + per-tile partial BN stats.

    xf_ref   : (1, Cin, Pt_pad)  zero-padded flattened halo tile
               (channels on sublanes, flattened padded spatial on lanes)
    w2_ref   : (Cout, K9)        folded conv weights (resident)
    mask_ref : (1, L)            1.0 on valid output columns, 0.0 on garbage cols
    y_ref    : (1, Cout, L)      conv output tile (masked), lane-dense
    sum_ref, sumsq_ref : (1, Cout, 1) per-tile partial statistics
    """
    xt = xf_ref[0]                                              # (Cin, Pt_pad)
    # Build the (9*Cin, L) patch with static lane shifts, then ONE MXU matmul.
    patch = jnp.concatenate([xt[:, s:s + L] for s in shifts], axis=0)
    y = jnp.dot(w2_ref[...].astype(compute_dtype),
                patch.astype(compute_dtype),
                preferred_element_type=jnp.float32)             # (Cout, L)
    ym = y * mask_ref[...]                                      # zero garbage cols
    y_ref[0] = ym
    sum_ref[0] = jnp.sum(ym, axis=1, keepdims=True)             # (Cout, 1)
    sumsq_ref[0] = jnp.sum(ym * ym, axis=1, keepdims=True)      # (Cout, 1)


def _bn_lrelu_kernel(y_ref, sum_ref, sumsq_ref, gamma_ref, beta_ref, o_ref, *,
                     inv_count, eps, slope):
    """Phase 2: BatchNorm (training-mode batch stats) + LeakyReLU, tiled over M."""
    mean = sum_ref[...] * inv_count                             # (Cout, 1)
    var = sumsq_ref[...] * inv_count - mean * mean              # biased variance
    scale = gamma_ref[...] * lax.rsqrt(var + eps)
    bias = beta_ref[...] - mean * scale
    z = y_ref[0] * scale + bias                                 # (Cout, L)
    o_ref[0] = jnp.where(z > 0, z, slope * z)


def conv_block(x_nchw, weight, gamma, beta, *, padding=1, eps=1e-5,
               negative_slope=0.2, compute_dtype=jnp.float32):
    """Equivalent of Conv(inc, outc, 3, stride=1, padding=1).forward(x).

    x_nchw: (N, Cin, H, W) f32, weight: (Cout, Cin, 3, 3) f32 (OIHW),
    gamma/beta: (Cout,) BatchNorm affine. Returns (N, Cout, H, W) f32.
    """
    N, Cin, H, W = x_nchw.shape
    Cout, Cin_w, KH, KW = weight.shape
    assert Cin_w == Cin and KH == 3 and KW == 3 and padding == 1

    K9 = KH * KW * Cin
    TILE_H = _pick_tile_h(H, W, Cin, Cout, K9)
    num_ht = H // TILE_H
    NT = N * num_ht
    Wp = W + 2                               # row stride of padded/flattened tiles
    L = TILE_H * Wp                          # flat output length per tile (lanes)
    Pt = (TILE_H + 2) * Wp                   # real flat input length per tile
    Pt_pad = _round_up(Pt + 2, 128)          # +2 slack for the max tap shift
    shifts = tuple(kh * Wp + kw for kh in range(KH) for kw in range(KW))

    # ---- glue: halo'd, flattened, channels-on-sublane tiles (no 9x im2col) ----
    xp = jnp.pad(x_nchw.astype(jnp.float32),
                 ((0, 0), (0, 0), (padding, padding), (padding, padding)))
    tiles = jnp.stack(
        [xp[:, :, t * TILE_H: t * TILE_H + TILE_H + 2, :] for t in range(num_ht)],
        axis=1)                                       # (N, num_ht, Cin, TILE_H+2, Wp)
    xf = tiles.reshape(NT, Cin, Pt)
    xf = jnp.pad(xf, ((0, 0), (0, 0), (0, Pt_pad - Pt)))

    # Folded weights: W2[co, k*Cin + ci] = weight[co, ci, kh, kw], k = kh*KW + kw.
    w2 = jnp.transpose(weight.astype(jnp.float32), (0, 2, 3, 1)).reshape(Cout, K9)
    # Valid-column mask (garbage columns w >= W in the padded-width flat layout).
    mask = (jnp.arange(L, dtype=jnp.int32) % Wp < W).astype(jnp.float32).reshape(1, L)

    cparams = pltpu.CompilerParams(dimension_semantics=("parallel",),
                                   vmem_limit_bytes=32 * 1024 * 1024)

    # ---------------- phase 1: conv + per-tile partial BN stats ----------------
    kernel1 = functools.partial(_conv_stats_kernel, shifts=shifts, L=L,
                                compute_dtype=compute_dtype)
    y, psum, psumsq = pl.pallas_call(
        kernel1,
        grid=(NT,),
        in_specs=[
            pl.BlockSpec((1, Cin, Pt_pad), lambda i: (i, 0, 0)),   # activation stream
            pl.BlockSpec((Cout, K9), lambda i: (0, 0)),            # weights (resident)
            pl.BlockSpec((1, L), lambda i: (0, 0)),                # mask (resident)
        ],
        out_specs=[
            pl.BlockSpec((1, Cout, L), lambda i: (i, 0, 0)),
            pl.BlockSpec((1, Cout, 1), lambda i: (i, 0, 0)),
            pl.BlockSpec((1, Cout, 1), lambda i: (i, 0, 0)),
        ],
        out_shape=[
            jax.ShapeDtypeStruct((NT, Cout, L), jnp.float32),
            jax.ShapeDtypeStruct((NT, Cout, 1), jnp.float32),
            jax.ShapeDtypeStruct((NT, Cout, 1), jnp.float32),
        ],
        compiler_params=cparams,
    )(xf, w2, mask)

    # Tiny cross-tile reduction of the partial statistics (NT x Cout values).
    sums = jnp.sum(psum, axis=0)          # (Cout, 1)
    sumsqs = jnp.sum(psumsq, axis=0)      # (Cout, 1)
    g2 = gamma.astype(jnp.float32).reshape(Cout, 1)
    b2 = beta.astype(jnp.float32).reshape(Cout, 1)

    # ---------------- phase 2: normalize + affine + LeakyReLU ----------------
    kernel2 = functools.partial(_bn_lrelu_kernel, inv_count=1.0 / float(N * H * W),
                                eps=eps, slope=negative_slope)
    out_t = pl.pallas_call(
        kernel2,
        grid=(NT,),
        in_specs=[
            pl.BlockSpec((1, Cout, L), lambda i: (i, 0, 0)),
            pl.BlockSpec((Cout, 1), lambda i: (0, 0)),
            pl.BlockSpec((Cout, 1), lambda i: (0, 0)),
            pl.BlockSpec((Cout, 1), lambda i: (0, 0)),
            pl.BlockSpec((Cout, 1), lambda i: (0, 0)),
        ],
        out_specs=pl.BlockSpec((1, Cout, L), lambda i: (i, 0, 0)),
        out_shape=jax.ShapeDtypeStruct((NT, Cout, L), jnp.float32),
        compiler_params=cparams,
    )(y, sums, sumsqs, g2, b2)

    # ---- glue: drop garbage columns, back to PyTorch NCHW ----
    out = out_t.reshape(N, num_ht, Cout, TILE_H, Wp)[..., :W]
    out = jnp.transpose(out, (0, 2, 1, 3, 4)).reshape(N, Cout, H, W)
    return out


def _reference(x, weight, gamma, beta, padding=1):
    """Pure-JAX reference matching PyTorch Conv2d+BatchNorm2d(train)+LeakyReLU."""
    y = lax.conv_general_dilated(
        x, weight, window_strides=(1, 1),
        padding=[(padding, padding), (padding, padding)],
        dimension_numbers=('NCHW', 'OIHW', 'NCHW'))
    mean = jnp.mean(y, axis=(0, 2, 3), keepdims=True)
    var = jnp.mean((y - mean) ** 2, axis=(0, 2, 3), keepdims=True)
    yn = (y - mean) * lax.rsqrt(var + 1e-5)
    yn = yn * gamma.reshape(1, -1, 1, 1) + beta.reshape(1, -1, 1, 1)
    return jnp.where(yn > 0, yn, 0.2 * yn)


if __name__ == "__main__":
    # Conv(inc=4, outc=8, kernel_size=3, stride=1, padding=1)
    N, Cin, Cout, H, W = 2, 4, 8, 16, 16
    key = jax.random.PRNGKey(0)
    kx, kw, kg, kb = jax.random.split(key, 4)

    x = jax.random.normal(kx, (N, Cin, H, W), dtype=jnp.float32)
    weight = 0.1 * jax.random.normal(kw, (Cout, Cin, 3, 3), dtype=jnp.float32)
    gamma = 1.0 + 0.1 * jax.random.normal(kg, (Cout,), dtype=jnp.float32)
    beta = 0.1 * jax.random.normal(kb, (Cout,), dtype=jnp.float32)
    # TODO(synk): BatchNorm running-stat (momentum) buffer updates are stateful
    # training bookkeeping, not part of the forward math, so they are omitted.

    out = jax.block_until_ready(jax.jit(conv_block)(x, weight, gamma, beta))

    ref = _reference(x, weight, gamma, beta)
    np.testing.assert_allclose(np.asarray(out), np.asarray(ref),
                               rtol=1e-4, atol=1e-4)
    print("KERNEL_OK")
</pallas_src>

<mosaic_0001>
module attributes {stable_mosaic.version = 11 : i64} {
  func.func @_conv_stats_kernel(%arg0: i32, %arg1: memref<1x4x384xf32, #tpu.memory_space<vmem>>, %arg2: memref<8x36xf32, #tpu.memory_space<vmem>>, %arg3: memref<1x288xf32, #tpu.memory_space<vmem>>, %arg4: memref<1x8x288xf32, #tpu.memory_space<vmem>>, %arg5: memref<1x8x1xf32, #tpu.memory_space<vmem>>, %arg6: memref<1x8x1xf32, #tpu.memory_space<vmem>>) attributes {dimension_semantics = [#tpu.dimension_semantics<parallel>], iteration_bounds = array<i64: 2>, scalar_prefetch = 0 : i64, scratch_operands = 0 : i64, tpu.core_type = #tpu.core_type<tc>, window_params = [{transform_indices = @transform_0, window_bounds = array<i64: 1, 4, 384>}, {pipeline_mode = #tpu.pipeline_mode<synchronous>, transform_indices = @transform_1, window_bounds = array<i64: 8, 36>}, {pipeline_mode = #tpu.pipeline_mode<synchronous>, transform_indices = @transform_2, window_bounds = array<i64: 1, 288>}, {transform_indices = @transform_3, window_bounds = array<i64: 1, 8, 288>}, {transform_indices = @transform_4, window_bounds = array<i64: 1, 8, 1>}, {transform_indices = @transform_5, window_bounds = array<i64: 1, 8, 1>}]} {
    %c0 = arith.constant 0 : index
    %c0_0 = arith.constant 0 : index
    %c0_1 = arith.constant 0 : index
    %0 = vector.load %arg1[%c0, %c0_0, %c0_1] : memref<1x4x384xf32, #tpu.memory_space<vmem>>, vector<1x4x384xf32>
    %1 = vector.shape_cast %0 : vector<1x4x384xf32> to vector<4x384xf32>
    %2 = vector.extract_strided_slice %1 {offsets = [0, 0], sizes = [4, 288], strides = [1, 1]} : vector<4x384xf32> to vector<4x288xf32>
    %3 = vector.extract_strided_slice %1 {offsets = [0, 1], sizes = [4, 288], strides = [1, 1]} : vector<4x384xf32> to vector<4x288xf32>
    %4 = vector.extract_strided_slice %1 {offsets = [0, 2], sizes = [4, 288], strides = [1, 1]} : vector<4x384xf32> to vector<4x288xf32>
    %5 = vector.extract_strided_slice %1 {offsets = [0, 18], sizes = [4, 288], strides = [1, 1]} : vector<4x384xf32> to vector<4x288xf32>
    %6 = vector.extract_strided_slice %1 {offsets = [0, 19], sizes = [4, 288], strides = [1, 1]} : vector<4x384xf32> to vector<4x288xf32>
    %7 = vector.extract_strided_slice %1 {offsets = [0, 20], sizes = [4, 288], strides = [1, 1]} : vector<4x384xf32> to vector<4x288xf32>
    %8 = vector.extract_strided_slice %1 {offsets = [0, 36], sizes = [4, 288], strides = [1, 1]} : vector<4x384xf32> to vector<4x288xf32>
    %9 = vector.extract_strided_slice %1 {offsets = [0, 37], sizes = [4, 288], strides = [1, 1]} : vector<4x384xf32> to vector<4x288xf32>
    %10 = vector.extract_strided_slice %1 {offsets = [0, 38], sizes = [4, 288], strides = [1, 1]} : vector<4x384xf32> to vector<4x288xf32>
    %11 = tpu.concatenate %2, %3, %4, %5, %6, %7, %8, %9, %10 in 0 : vector<4x288xf32>, vector<4x288xf32>, vector<4x288xf32>, vector<4x288xf32>, vector<4x288xf32>, vector<4x288xf32>, vector<4x288xf32>, vector<4x288xf32>, vector<4x288xf32> -> vector<36x288xf32>
    %c0_2 = arith.constant 0 : index
    %c0_3 = arith.constant 0 : index
    %12 = vector.load %arg2[%c0_2, %c0_3] : memref<8x36xf32, #tpu.memory_space<vmem>>, vector<8x36xf32>
    %cst = arith.constant dense<0.000000e+00> : vector<8x288xf32>
    %13 = tpu.matmul %12, %11, %cst {dimension_numbers = #tpu.dot_dimension_numbers<[1], [0], [0], [1], [0, 0, 1, 1], [], []>} : vector<8x36xf32>, vector<36x288xf32>, vector<8x288xf32> -> vector<8x288xf32>
    %c0_4 = arith.constant 0 : index
    %c0_5 = arith.constant 0 : index
    %14 = vector.load %arg3[%c0_4, %c0_5] : memref<1x288xf32, #tpu.memory_space<vmem>>, vector<1x288xf32>
    %15 = vector.broadcast %14 : vector<1x288xf32> to vector<8x288xf32>
    %16 = arith.mulf %13, %15 : vector<8x288xf32>
    %c0_6 = arith.constant 0 : index
    %c0_7 = arith.constant 0 : index
    %c0_8 = arith.constant 0 : index
    %17 = vector.load %arg4[%c0_6, %c0_7, %c0_8] : memref<1x8x288xf32, #tpu.memory_space<vmem>>, vector<1x8x288xf32>
    %18 = vector.shape_cast %17 : vector<1x8x288xf32> to vector<8x288xf32>
    %19 = vector.shape_cast %16 : vector<8x288xf32> to vector<1x8x288xf32>
    tpu.vector_store %arg4[%c0_6, %c0_7, %c0_8], %19 {strides = array<i32>} : memref<1x8x288xf32, #tpu.memory_space<vmem>>, vector<1x8x288xf32>,
    %cst_9 = arith.constant dense<0.000000e+00> : vector<8xf32>
    %20 = vector.multi_reduction <add>, %16, %cst_9 [1] : vector<8x288xf32> to vector<8xf32>
    %21 = vector.shape_cast %20 : vector<8xf32> to vector<8x1xf32>
    %c0_10 = arith.constant 0 : index
    %c0_11 = arith.constant 0 : index
    %c0_12 = arith.constant 0 : index
    %22 = vector.load %arg5[%c0_10, %c0_11, %c0_12] : memref<1x8x1xf32, #tpu.memory_space<vmem>>, vector<1x8x1xf32>
    %23 = vector.shape_cast %22 : vector<1x8x1xf32> to vector<8x1xf32>
    %24 = vector.shape_cast %21 : vector<8x1xf32> to vector<1x8x1xf32>
    tpu.vector_store %arg5[%c0_10, %c0_11, %c0_12], %24 {strides = array<i32>} : memref<1x8x1xf32, #tpu.memory_space<vmem>>, vector<1x8x1xf32>,
    %25 = arith.mulf %16, %16 : vector<8x288xf32>
    %cst_13 = arith.constant dense<0.000000e+00> : vector<8xf32>
    %26 = vector.multi_reduction <add>, %25, %cst_13 [1] : vector<8x288xf32> to vector<8xf32>
    %27 = vector.shape_cast %26 : vector<8xf32> to vector<8x1xf32>
    %c0_14 = arith.constant 0 : index
    %c0_15 = arith.constant 0 : index
    %c0_16 = arith.constant 0 : index
    %28 = vector.load %arg6[%c0_14, %c0_15, %c0_16] : memref<1x8x1xf32, #tpu.memory_space<vmem>>, vector<1x8x1xf32>
    %29 = vector.shape_cast %28 : vector<1x8x1xf32> to vector<8x1xf32>
    %30 = vector.shape_cast %27 : vector<8x1xf32> to vector<1x8x1xf32>
    tpu.vector_store %arg6[%c0_14, %c0_15, %c0_16], %30 {strides = array<i32>} : memref<1x8x1xf32, #tpu.memory_space<vmem>>, vector<1x8x1xf32>,
    return
  }
  func.func @transform_0(%arg0: i32) -> (i32, i32, i32) {
    %c0_i32 = arith.constant 0 : i32
    %c0_i32_0 = arith.constant 0 : i32
    %c0_i32_1 = arith.constant 0 : i32
    return %arg0, %c0_i32, %c0_i32_0 : i32, i32, i32
  }
  func.func @transform_1(%arg0: i32) -> (i32, i32) {
    %c0_i32 = arith.constant 0 : i32
    %c0_i32_0 = arith.constant 0 : i32
    %c0_i32_1 = arith.constant 0 : i32
    return %c0_i32, %c0_i32_0 : i32, i32
  }
  func.func @transform_2(%arg0: i32) -> (i32, i32) {
    %c0_i32 = arith.constant 0 : i32
    %c0_i32_0 = arith.constant 0 : i32
    %c0_i32_1 = arith.constant 0 : i32
    return %c0_i32, %c0_i32_0 : i32, i32
  }
  func.func @transform_3(%arg0: i32) -> (i32, i32, i32) {
    %c0_i32 = arith.constant 0 : i32
    %c0_i32_0 = arith.constant 0 : i32
    %c0_i32_1 = arith.constant 0 : i32
    return %arg0, %c0_i32, %c0_i32_0 : i32, i32, i32
  }
  func.func @transform_4(%arg0: i32) -> (i32, i32, i32) {
    %c0_i32 = arith.constant 0 : i32
    %c0_i32_0 = arith.constant 0 : i32
    %c0_i32_1 = arith.constant 0 : i32
    return %arg0, %c0_i32, %c0_i32_0 : i32, i32, i32
  }
  func.func @transform_5(%arg0: i32) -> (i32, i32, i32) {
    %c0_i32 = arith.constant 0 : i32
    %c0_i32_0 = arith.constant 0 : i32
    %c0_i32_1 = arith.constant 0 : i32
    return %arg0, %c0_i32, %c0_i32_0 : i32, i32, i32
  }
}

module attributes {stable_mosaic.version = 11 : i64} {
  func.func @_bn_lrelu_kernel(%arg0: i32, %arg1: memref<1x8x288xf32, #tpu.memory_space<vmem>>, %arg2: memref<8x1xf32, #tpu.memory_space<vmem>>, %arg3: memref<8x1xf32, #tpu.memory_space<vmem>>, %arg4: memref<8x1xf32, #tpu.memory_space<vmem>>, %arg5: memref<8x1xf32, #tpu.memory_space<vmem>>, %arg6: memref<1x8x288xf32, #tpu.memory_space<vmem>>) attributes {dimension_semantics = [#tpu.dimension_semantics<parallel>], iteration_bounds = array<i64: 2>, scalar_prefetch = 0 : i64, scratch_operands = 0 : i64, tpu.core_type = #tpu.core_type<tc>, window_params = [{transform_indices = @transform_0, window_bounds = array<i64: 1, 8, 288>}, {pipeline_mode = #tpu.pipeline_mode<synchronous>, transform_indices = @transform_1, window_bounds = array<i64: 8, 1>}, {pipeline_mode = #tpu.pipeline_mode<synchronous>, transform_indices = @transform_2, window_bounds = array<i64: 8, 1>}, {pipeline_mode = #tpu.pipeline_mode<synchronous>, transform_indices = @transform_3, window_bounds = array<i64: 8, 1>}, {pipeline_mode = #tpu.pipeline_mode<synchronous>, transform_indices = @transform_4, window_bounds = array<i64: 8, 1>}, {transform_indices = @transform_5, window_bounds = array<i64: 1, 8, 288>}]} {
    %c0 = arith.constant 0 : index
    %c0_0 = arith.constant 0 : index
    %0 = vector.load %arg2[%c0, %c0_0] : memref<8x1xf32, #tpu.memory_space<vmem>>, vector<8x1xf32>
    %cst = arith.constant 0.001953125 : f32
    %1 = vector.broadcast %cst : f32 to vector<8x1xf32>
    %2 = arith.mulf %0, %1 : vector<8x1xf32>
    %c0_1 = arith.constant 0 : index
    %c0_2 = arith.constant 0 : index
    %3 = vector.load %arg3[%c0_1, %c0_2] : memref<8x1xf32, #tpu.memory_space<vmem>>, vector<8x1xf32>
    %cst_3 = arith.constant 0.001953125 : f32
    %4 = vector.broadcast %cst_3 : f32 to vector<8x1xf32>
    %5 = arith.mulf %3, %4 : vector<8x1xf32>
    %6 = arith.mulf %2, %2 : vector<8x1xf32>
    %7 = arith.subf %5, %6 : vector<8x1xf32>
    %c0_4 = arith.constant 0 : index
    %c0_5 = arith.constant 0 : index
    %8 = vector.load %arg4[%c0_4, %c0_5] : memref<8x1xf32, #tpu.memory_space<vmem>>, vector<8x1xf32>
    %cst_6 = arith.constant 9.99999974E-6 : f32
    %9 = vector.broadcast %cst_6 : f32 to vector<8x1xf32>
    %10 = arith.addf %7, %9 : vector<8x1xf32>
    %11 = math.rsqrt %10 : vector<8x1xf32>
    %12 = arith.mulf %8, %11 : vector<8x1xf32>
    %c0_7 = arith.constant 0 : index
    %c0_8 = arith.constant 0 : index
    %13 = vector.load %arg5[%c0_7, %c0_8] : memref<8x1xf32, #tpu.memory_space<vmem>>, vector<8x1xf32>
    %14 = arith.mulf %2, %12 : vector<8x1xf32>
    %15 = arith.subf %13, %14 : vector<8x1xf32>
    %c0_9 = arith.constant 0 : index
    %c0_10 = arith.constant 0 : index
    %c0_11 = arith.constant 0 : index
    %16 = vector.load %arg1[%c0_9, %c0_10, %c0_11] : memref<1x8x288xf32, #tpu.memory_space<vmem>>, vector<1x8x288xf32>
    %17 = vector.shape_cast %16 : vector<1x8x288xf32> to vector<8x288xf32>
    %18 = vector.broadcast %12 : vector<8x1xf32> to vector<8x288xf32>
    %19 = arith.mulf %17, %18 : vector<8x288xf32>
    %20 = vector.broadcast %15 : vector<8x1xf32> to vector<8x288xf32>
    %21 = arith.addf %19, %20 : vector<8x288xf32>
    %cst_12 = arith.constant 0.000000e+00 : f32
    %22 = vector.broadcast %cst_12 : f32 to vector<8x288xf32>
    %23 = arith.cmpf ogt, %21, %22 : vector<8x288xf32>
    %cst_13 = arith.constant 2.000000e-01 : f32
    %24 = vector.broadcast %cst_13 : f32 to vector<8x288xf32>
    %25 = arith.mulf %24, %21 : vector<8x288xf32>
    %26 = arith.select %23, %21, %25 : vector<8x288xi1>, vector<8x288xf32>
    %c0_14 = arith.constant 0 : index
    %c0_15 = arith.constant 0 : index
    %c0_16 = arith.constant 0 : index
    %27 = vector.load %arg6[%c0_14, %c0_15, %c0_16] : memref<1x8x288xf32, #tpu.memory_space<vmem>>, vector<1x8x288xf32>
    %28 = vector.shape_cast %27 : vector<1x8x288xf32> to vector<8x288xf32>
    %29 = vector.shape_cast %26 : vector<8x288xf32> to vector<1x8x288xf32>
    tpu.vector_store %arg6[%c0_14, %c0_15, %c0_16], %29 {strides = array<i32>} : memref<1x8x288xf32, #tpu.memory_space<vmem>>, vector<1x8x288xf32>,
    return
  }
  func.func @transform_0(%arg0: i32) -> (i32, i32, i32) {
    %c0_i32 = arith.constant 0 : i32
    %c0_i32_0 = arith.constant 0 : i32
    %c0_i32_1 = arith.constant 0 : i32
    return %arg0, %c0_i32, %c0_i32_0 : i32, i32, i32
  }
  func.func @transform_1(%arg0: i32) -> (i32, i32) {
    %c0_i32 = arith.constant 0 : i32
    %c0_i32_0 = arith.constant 0 : i32
    %c0_i32_1 = arith.constant 0 : i32
    return %c0_i32, %c0_i32_0 : i32, i32
  }
  func.func @transform_2(%arg0: i32) -> (i32, i32) {
    %c0_i32 = arith.constant 0 : i32
    %c0_i32_0 = arith.constant 0 : i32
    %c0_i32_1 = arith.constant 0 : i32
    return %c0_i32, %c0_i32_0 : i32, i32
  }
  func.func @transform_3(%arg0: i32) -> (i32, i32) {
    %c0_i32 = arith.constant 0 : i32
    %c0_i32_0 = arith.constant 0 : i32
    %c0_i32_1 = arith.constant 0 : i32
    return %c0_i32, %c0_i32_0 : i32, i32
  }
  func.func @transform_4(%arg0: i32) -> (i32, i32) {
    %c0_i32 = arith.constant 0 : i32
    %c0_i32_0 = arith.constant 0 : i32
    %c0_i32_1 = arith.constant 0 : i32
    return %c0_i32, %c0_i32_0 : i32, i32
  }
  func.func @transform_5(%arg0: i32) -> (i32, i32, i32) {
    %c0_i32 = arith.constant 0 : i32
    %c0_i32_0 = arith.constant 0 : i32
    %c0_i32_1 = arith.constant 0 : i32
    return %arg0, %c0_i32, %c0_i32_0 : i32, i32, i32
  }
}

</mosaic_0001>

<bundles_post_ra>
// kernel: conv_block.3
= control target key start
LH: loop header
LB: loop body
LE: loop exit
PB: predicated region body
PF: predicated region fallthrough
CT: control target
= control target key end

     0   :  { %s395_s18 = smov 0   ;;  %s428_s0 = inlined_call_operand.vmem [shape: f32[2,8,288], index: 0, kind: input, shape index: {}]   ;;  %s429_s1 = inlined_call_operand.vmem [shape: f32[8,1], index: 1, kind: input, shape index: {}]   ;;  %s430_s2 = inlined_call_operand.vmem [shape: f32[8,1], index: 2, kind: input, shape index: {}]   ;;  %s431_s3 = inlined_call_operand.vmem [shape: f32[8,1], index: 3, kind: input, shape index: {}]   ;;  %s432_s4 = inlined_call_operand.vmem [shape: f32[8,1], index: 4, kind: input, shape index: {}]   ;;  %s433_s5 = inlined_call_operand.vmem [shape: f32[2,8,288], index: 5, kind: output, shape index: {}]  }
   0x1 LB: > { %s334_s19 = sadd.s32 4294967295, %s362_s18   ;;  %p338_p0 = scmp.ge.s32.totalorder %s362_s18, 1  ;;  %s362_s18 = sphi %s395_s18, %s15_s18  }
   0x2   : > { %p187_p1 = scmp.lt.s32.totalorder %s362_s18, 3 }
   0x4   : > { %p188_p2 = pnand %p338_p0, %p187_p1 }
   0x5   : > { %p215_p3 = scmp.lt.s32.totalorder (!%p188_p2), %s334_s19, 1 }
   0x6   : > { %191 = sbr.rel (%p188_p2) target bundleno = 171 (0xab), region = 40 }
   0xb   : > { %v225_v0 = vld [vmem:[%s429_s1] sm:$0xff]  ;;  %v364_v2 = vmov 0   ;;  %s435_s19 = smov (!%p215_p3, %s334_s19), 1  ;;  %vm277_vm6 = vcmask 261120  }
   0xc   : > { %v227_v1 = vld [vmem:[%s430_s2] sm:$0xff]  ;;  %353 = vset.pattern.permute.xlu0 %v364_v2  ;;  %v226_v3 = vmul.f32 0.001953125, %v225_v0  ;;  %s343_s28 = smul.u32 24, %s435_s19 }
   0xd   : > { %v228_v4 = vmul.f32 0.001953125, %v227_v1  ;;  %v231_v13 = vld [vmem:[%s431_s3] sm:$0xff] }
   0xe   : > { %v229_v5 = vmul.f32 %v226_v3, %v226_v3  ;;  %v244_v18 = vld [vmem:[%s432_s4] sm:$0xff]  ;;  %s219_s6 = scalar_lea.vmem %s428_s0, %s343_s28  ;;  %s224_s9 = scalar_lea.vmem %s433_s5, %s343_s28 }
   0xf   : > { %v247_v21 = vld [vmem:[%s219_s6] sm:$0xff]  ;;  %v248_v22 = vld [vmem:[%s219_s6 + $0x8] sm:$0xff]  ;;  %v249_v23 = vld [vmem:[%s219_s6 + $0x10] sm:$0xff] }
  0x10   : > { %v230_v6 = vsub.f32 %v228_v4, %v229_v5 }
  0x12   : > { %v232_v7 = vadd.f32 1e-05, %v230_v6 }
  0x14   : > { %354 = vrsqrt.f32 %v232_v7  ;;  %vm239_vm0 = vweird.f32 %v232_v7 }
  0x1a   : > { %v355_v8 = vpop.eup %354 }
  0x1b   : > { %v234_v9 = vmul.f32 %v355_v8, %v232_v7  ;;  %vm240_vm1 = vweird.f32 %v355_v8 }
  0x1c   : > { %vm241_vm2 = vmor %vm239_vm0, %vm240_vm1 }
  0x1d   : > { %v235_v10 = vmul.f32 %v355_v8, %v234_v9 }
  0x1f   : > { %v236_v11 = vmul.f32 0.5, %v235_v10 }
  0x21   : > { %v237_v12 = vsub.f32 1.5, %v236_v11 }
  0x23   : > { %v238_v14 = vmul.f32 %v355_v8, %v237_v12 }
  0x25   : > { %v242_v15 = vsel %vm241_vm2, %v355_v8, %v238_v14 }
  0x26   : > { %v243_v16 = vmul.f32 %v242_v15, %v231_v13 }
  0x28   : > { %252 = vperm.xlu0 %353, %v243_v16   ;;  %v245_v17 = vmul.f32 %v243_v16, %v226_v3 }
  0x2a   : > { %v246_v19 = vsub.f32 %v244_v18, %v245_v17 }
  0x30   : > { %260 = vperm.xlu0 %353, %v246_v19  }
  0x9a   : > { %v253_v20 = vpop.permute.xlu0 %252 }
  0x9b   : > { %v255_v24 = vmul.f32 %v253_v20, %v247_v21  ;;  %v256_v25 = vmul.f32 %v253_v20, %v248_v22  ;;  %v257_v26 = vmul.f32 %v253_v20, %v249_v23 }
  0xa2   : > { %v261_v27 = vpop.permute.xlu0 %260 }
  0xa3   : > { %v263_v28 = vadd.f32 %v261_v27, %v255_v24  ;;  %v264_v29 = vadd.f32 %v261_v27, %v256_v25  ;;  %v265_v30 = vadd.f32 %v261_v27, %v257_v26 }
  0xa5   : > { %vm266_vm3 = vcmp.gt.f32.partialorder %v263_v28, 0.0  ;;  %vm267_vm4 = vcmp.gt.f32.partialorder %v264_v29, 0.0  ;;  %vm268_vm5 = vcmp.gt.f32.partialorder %v265_v30, 0.0  ;;  %v269_v31 = vmul.f32 0.2, %v263_v28 }
  0xa6   : > { %v270_v32 = vmul.f32 0.2, %v264_v29  ;;  %v271_v33 = vmul.f32 0.2, %v265_v30 }
  0xa7   : > { %v272_v34 = vsel %vm266_vm3, %v263_v28, %v269_v31 }
  0xa8   : > { %v273_v35 = vsel %vm267_vm4, %v264_v29, %v270_v32  ;;  %v274_v36 = vsel %vm268_vm5, %v265_v30, %v271_v33  ;;  %275 = vst [vmem:[%s224_s9] sm:$0xff] %v272_v34 }
  0xa9   : > { %276 = vst [vmem:[%s224_s9 + $0x8] sm:$0xff] %v273_v35 }
  0xaa   : > { %278 = vst.msk [vmem:[%s224_s9 + $0x10] sm:$0xff] %vm277_vm6, %v274_v36 }
  0xab PF: > { %s15_s18 = sadd.s32 1, %s362_s18  }
  0xac   : > { %p12_p4 = scmp.ge.s32.totalorder %s15_s18, 4  }
  0xae   :  { %14 = sbr.rel (!%p12_p4) target bundleno = 1 (0x1), region = 70 }

// kernel: conv_block.2
= control target key start
LH: loop header
LB: loop body
LE: loop exit
PB: predicated region body
PF: predicated region fallthrough
CT: control target
= control target key end

     0   :  { %s752_s18 = smov 0   ;;  %s847_s0 = inlined_call_operand.vmem [shape: f32[2,4,384], index: 0, kind: input, shape index: {}]   ;;  %s848_s1 = inlined_call_operand.vmem [shape: f32[8,36], index: 1, kind: input, shape index: {}]   ;;  %s849_s2 = inlined_call_operand.vmem [shape: f32[1,288], index: 2, kind: input, shape index: {}]   ;;  %s850_s3 = inlined_call_operand.vmem [shape: f32[2,8,288], index: 3, kind: output, shape index: {0}]   ;;  %s851_s4 = inlined_call_operand.vmem [shape: f32[2,8,1], index: 4, kind: output, shape index: {1}]   ;;  %s852_s5 = inlined_call_operand.vmem [shape: f32[2,8,1], index: 5, kind: output, shape index: {2}]  }
   0x1 LB: > { %s636_s19 = sadd.s32 4294967295, %s712_s18   ;;  %p640_p0 = scmp.ge.s32.totalorder %s712_s18, 1  ;;  %s712_s18 = sphi %s752_s18, %s16_s18  }
   0x2   : > { %p192_p1 = scmp.lt.s32.totalorder %s712_s18, 3 }
   0x4   : > { %p193_p2 = pnand %p640_p0, %p192_p1 }
   0x5   : > { %p228_p3 = scmp.lt.s32.totalorder (!%p193_p2), %s636_s19, 1  ;;  %s714_s24 = smov (!%p193_p2), 127  }
   0x6   : > { %196 = sbr.rel (%p193_p2) target bundleno = 478 (0x1de), region = 32  ;;  %s715_s25 = smov (!%p193_p2), 126  }
   0x7   : > { %s716_s26 = smov (!%p193_p2), 110   ;;  %s717_s27 = smov (!%p193_p2), 109  }
   0x8   : > { %s718_s28 = smov (!%p193_p2), 108   ;;  %s719_s29 = smov (!%p193_p2), 92  }
   0x9   : > { %s720_s30 = smov (!%p193_p2), 91   ;;  %s721_s6 = smov (!%p193_p2), 90  }
   0xb   : > { %s854_s19 = smov (!%p228_p3, %s636_s19), 1  ;;  %vm404_vm0 = vcmask 1043456   ;;  %vm327_vm1 = vcmask 891904   ;;  %vm383_vm2 = vcmask 744448   ;;  %vm346_vm3 = vcmask 883712  }
   0xc   : > { %s653_s20 = smul.u32 12, %s854_s19  ;;  %vm401_vm4 = vcmask 736256   ;;  %vm364_vm5 = vcmask 752640   ;;  %vm418_vm6 = vcmask 293888   ;;  %vm290_vm7 = vcmask 1031168   ;;  %s643_s15 = sshll.u32 %s854_s19, 3 }
   0xd   : > { %vm272_vm8 = vcmask 1039360   ;;  %vm309_vm9 = vcmask 900096   ;;  %s654_s11 = smul.u32 24, %s854_s19  ;;  %vm501_vm10 = vcmask 261120   ;;  %vm508_vm11 = vcmask 7168  }
   0xe   : > { %s232_s23 = scalar_lea.vmem %s847_s0, %s653_s20  ;;  %s241_s20 = scalar_lea.vmem %s851_s4, %s643_s15 }
   0xf   : > { %v246_v0 = vld [vmem:[%s232_s23] sm:$0xff]  ;;  %v247_v1 = vld [vmem:[%s232_s23 + $0x8] sm:$0xf]  ;;  %s237_s14 = scalar_lea.vmem %s850_s3, %s654_s11  ;;  %s245_s23 = scalar_lea.vmem %s852_s5, %s643_s15 }
  0x10   : > { %250 = vst [vmem:[#allocation1] ss:$2 sm:$0xff] %v246_v0 }
  0x11   : > { %252 = vst [vmem:[#allocation1 + $0x10] ss:$2 sm:$0xff] %v247_v1 }
  0x17   : > { %v766_v2 = vld.sshfl [vmem:[#allocation1] sm:$0xff pattern:$0x75316420]  ;;  %v768_v3 = vld.sshfl [vmem:[#allocation1 + $0x8] sm:$0xff pattern:$0x75316420] }
  0x18   : > { %v770_v4 = vld.sshfl [vmem:[#allocation1 + $0x10] sm:$0xff pattern:$0x75316420]  ;;  %260 = vst [vmem:[#allocation1 + $0x1] ss:$2 sm:$0xff] %v246_v0 }
  0x19   : > { %262 = vst [vmem:[#allocation1 + $0x11] ss:$2 sm:$0xff] %v247_v1 }
  0x1f   : > { %v263_v5 = vld.sshfl [vmem:[#allocation1] sm:$0xff pattern:$0x75316420]  ;;  %v772_v6 = vld.sshfl [vmem:[#allocation1 + $0x8] sm:$0xff pattern:$0x75316420] }
  0x20   : > { %v265_v7 = vld.sshfl [vmem:[#allocation1 + $0x10] sm:$0xff pattern:$0x75316420]  ;;  %278 = vst [vmem:[#allocation1] ss:$2 sm:$0xff] %v246_v0 }
  0x21   : > { %280 = vst [vmem:[#allocation1 + $0x10] ss:$2 sm:$0xff] %v247_v1  ;;  %v671_v8 = vpack.i.bf16 %v263_v5, %v265_v7  ;;  %v417_v7 = vld [vmem:[%s848_s1] sm:$0xff] }
  0x23   : > { %672 = vrot.lane.b32.xlu2 %v671_v8, %s714_s24 }
  0x27   : > { %v281_v9 = vld.sshfl [vmem:[#allocation1] sm:$0xff pattern:$0x75316420]  ;;  %v282_v10 = vld.sshfl [vmem:[#allocation1 + $0x8] sm:$0xff pattern:$0x75316420] }
  0x28   : > { %v283_v11 = vld.sshfl [vmem:[#allocation1 + $0x10] sm:$0xff pattern:$0x75316420]  ;;  %297 = vst [vmem:[#allocation1 + $0x1] ss:$2 sm:$0xff] %v246_v0 }
  0x29   : > { %299 = vst [vmem:[#allocation1 + $0x11] ss:$2 sm:$0xff] %v247_v1  ;;  %v676_v12 = vpack.i.bf16 %v281_v9, %v283_v11 }
  0x2b   : > { %677 = vrot.lane.b32.xlu1 %v676_v12, %s715_s25 }
  0x2f   : > { %v300_v13 = vld.sshfl [vmem:[#allocation1] sm:$0xff pattern:$0x75316420]  ;;  %v301_v14 = vld.sshfl [vmem:[#allocation1 + $0x8] sm:$0xff pattern:$0x75316420] }
  0x30   : > { %v302_v15 = vld.sshfl [vmem:[#allocation1 + $0x10] sm:$0xff pattern:$0x75316420]  ;;  %315 = vst [vmem:[#allocation1] ss:$2 sm:$0xff] %v246_v0 }
  0x31   : > { %317 = vst [vmem:[#allocation1 + $0x10] ss:$2 sm:$0xff] %v247_v1  ;;  %v681_v16 = vpack.i.bf16 %v300_v13, %v302_v15 }
  0x33   : > { %682 = vrot.lane.b32.xlu2 %v681_v16, %s716_s26 }
  0x37   : > { %v318_v17 = vld.sshfl [vmem:[#allocation1] sm:$0xff pattern:$0x75316420]  ;;  %v319_v18 = vld.sshfl [vmem:[#allocation1 + $0x8] sm:$0xff pattern:$0x75316420] }
  0x38   : > { %v320_v19 = vld.sshfl [vmem:[#allocation1 + $0x10] sm:$0xff pattern:$0x75316420]  ;;  %323 = vrot.lane.b32.xlu0 %v319_v18, %s717_s27  ;;  %334 = vst [vmem:[#allocation1 + $0x1] ss:$2 sm:$0xff] %v246_v0 }
  0x39   : > { %336 = vst [vmem:[#allocation1 + $0x11] ss:$2 sm:$0xff] %v247_v1  ;;  %v686_v20 = vpack.i.bf16 %v318_v17, %v320_v19 }
  0x3b   : > { %687 = vrot.lane.b32.xlu1 %v686_v20, %s717_s27 }
  0x3f   : > { %v338_v21 = vld.sshfl [vmem:[#allocation1 + $0x8] sm:$0xff pattern:$0x75316420]  ;;  %v337_v22 = vld.sshfl [vmem:[#allocation1] sm:$0xff pattern:$0x75316420] }
  0x40   : > { %v339_v23 = vld.sshfl [vmem:[#allocation1 + $0x10] sm:$0xff pattern:$0x75316420]  ;;  %352 = vst [vmem:[#allocation1] ss:$2 sm:$0xff] %v246_v0 }
  0x41   : > { %354 = vst [vmem:[#allocation1 + $0x10] ss:$2 sm:$0xff] %v247_v1  ;;  %v691_v24 = vpack.i.bf16 %v337_v22, %v339_v23 }
  0x43   : > { %342 = vrot.lane.b32.xlu1 %v338_v21, %s718_s28  ;;  %692 = vrot.lane.b32.xlu2 %v691_v24, %s718_s28 }
  0x47   : > { %v355_v25 = vld.sshfl [vmem:[#allocation1] sm:$0xff pattern:$0x75316420]  ;;  %v356_v26 = vld.sshfl [vmem:[#allocation1 + $0x8] sm:$0xff pattern:$0x75316420] }
  0x48   : > { %v357_v27 = vld.sshfl [vmem:[#allocation1 + $0x10] sm:$0xff pattern:$0x75316420]  ;;  %371 = vst [vmem:[#allocation1 + $0x1] ss:$2 sm:$0xff] %v246_v0 }
  0x49   : > { %373 = vst [vmem:[#allocation1 + $0x11] ss:$2 sm:$0xff] %v247_v1  ;;  %v696_v28 = vpack.i.bf16 %v355_v25, %v357_v27 }
  0x4b   : > { %697 = vrot.lane.b32.xlu0 %v696_v28, %s719_s29 }
  0x4f   : > { %v374_v29 = vld.sshfl [vmem:[#allocation1] sm:$0xff pattern:$0x75316420]  ;;  %v375_v30 = vld.sshfl [vmem:[#allocation1 + $0x8] sm:$0xff pattern:$0x75316420] }
  0x50   : > { %v376_v31 = vld.sshfl [vmem:[#allocation1 + $0x10] sm:$0xff pattern:$0x75316420]  ;;  %389 = vst [vmem:[#allocation1] ss:$2 sm:$0xff] %v246_v0 }
  0x51   : > { %391 = vst [vmem:[#allocation1 + $0x10] ss:$2 sm:$0xff] %v247_v1  ;;  %v701_v32 = vpack.i.bf16 %v374_v29, %v376_v31 }
  0x53   : > { %360 = vrot.lane.b32.xlu0 %v356_v26, %s719_s29  ;;  %702 = vrot.lane.b32.xlu1 %v701_v32, %s720_s30 }
  0x57   : > { %v392_v33 = vld.sshfl [vmem:[#allocation1] sm:$0xff pattern:$0x75316420]  ;;  %v393_v35 = vld.sshfl [vmem:[#allocation1 + $0x8] sm:$0xff pattern:$0x75316420] }
  0x58   : > { %395 = vrot.lane.b32.xlu2 %v392_v33, %s721_s6  ;;  %v394_v34 = vld.sshfl [vmem:[#allocation1 + $0x10] sm:$0xff pattern:$0x75316420] }
  0x5b   : > { %399 = vrot.lane.b32.xlu0 %v394_v34, %s721_s6  ;;  %379 = vrot.lane.b32.xlu1 %v375_v30, %s720_s30  ;;  %v488_v34 = vld [vmem:[%s849_s2] sm:$0x7] }
  0x60   : > { %286 = vrot.lane.b32.xlu2 %v282_v10, %s715_s25 }
  0x63   : > { %268 = vrot.lane.b32.xlu1 %v772_v6, %s714_s24  ;;  %397 = vrot.lane.b32.xlu0 %v393_v35, %s721_s6  ;;  %v492_v35 = vperm.slane %v488_v34, 2 }
  0x6b   : > { %305 = vrot.lane.b32.xlu0 %v301_v14, %s716_s26 }
  0x7d   : > { %v783_v37 = vpop.permute.xlu2 %672 }
  0x7e   : > { %v674_v54 = vunpack.i.l.bf16 %v783_v37  ;;  %v675_v21 = vunpack.i.h.bf16 %v783_v37  ;;  %v491_v37 = vperm.slane %v488_v34, 1 }
  0x80   : > { %v407_v63 = vsel %vm404_vm0, %v770_v4, %v674_v54 }
  0x8d   : > { %v785_v40 = vpop.permute.xlu2 %682 }
  0x8e   : > { %v684_v49 = vunpack.i.l.bf16 %v785_v40  ;;  %v685_v22 = vunpack.i.h.bf16 %v785_v40 }
  0x9d   : > { %v781_v36 = vpop.permute.xlu1 %677  ;;  %v693_v44 = vpop.permute.xlu2 %692 }
  0x9e   : > { %v679_v50 = vunpack.i.l.bf16 %v781_v36  ;;  %v694_v51 = vunpack.i.l.bf16 %v693_v44  ;;  %v695_v60 = vunpack.i.h.bf16 %v693_v44  ;;  %v680_v19 = vunpack.i.h.bf16 %v781_v36 }
  0xa0   : > { %v410_v61 = vsel %vm404_vm0, %v679_v50, %v684_v49 }
  0xaa   : > { %v324_v38 = vpop.permute.xlu0 %323 }
  0xad   : > { %v688_v39 = vpop.permute.xlu1 %687 }
  0xae   : > { %v689_v52 = vunpack.i.l.bf16 %v688_v39  ;;  %v690_v55 = vunpack.i.h.bf16 %v688_v39 }
  0xb0   : > { %v413_v59 = vsel %vm404_vm0, %v689_v52, %v694_v51  ;;  %v328_v62 = vsel %vm327_vm1, %v690_v55, %v324_v38  ;;  %v329_v8 = vsel %vm327_vm1, %v324_v38, %v689_v52 }
  0xb2   : > { %v396_v56 = vpop.permute.xlu2 %395 }
  0xb5   : > { %v343_v42 = vpop.permute.xlu1 %342 }
  0xb6   : > { %v347_v9 = vsel %vm346_vm3, %v695_v60, %v343_v42  ;;  %v348_v12 = vsel %vm346_vm3, %v343_v42, %v694_v51 }
  0xb7   : > { %v411_v17 = vsel %vm404_vm0, %v328_v62, %v347_v9  ;;  %v412_v18 = vsel %vm404_vm0, %v329_v8, %v348_v12 }
  0xba   : > { %v287_v16 = vpop.permute.xlu2 %286 }
  0xbb   : > { %v291_v23 = vsel %vm290_vm7, %v680_v19, %v287_v16  ;;  %v292_v24 = vsel %vm290_vm7, %v287_v16, %v679_v50 }
  0xbd   : > { %v698_v41 = vpop.permute.xlu0 %697 }
  0xbe   : > { %v699_v47 = vunpack.i.l.bf16 %v698_v41  ;;  %v700_v0 = vunpack.i.h.bf16 %v698_v41 }
  0xc5   : > { %v361_v43 = vpop.permute.xlu0 %360  ;;  %v703_v45 = vpop.permute.xlu1 %702 }
  0xc6   : > { %v704_v46 = vunpack.i.l.bf16 %v703_v45  ;;  %v705_v57 = vunpack.i.h.bf16 %v703_v45  ;;  %v365_v4 = vsel %vm364_vm5, %v700_v0, %v361_v43  ;;  %v366_v13 = vsel %vm364_vm5, %v361_v43, %v699_v47 }
  0xc8   : > { %v416_v53 = vsel %vm404_vm0, %v699_v47, %v704_v46 }
  0xcd   : > { %v400_v48 = vpop.permute.xlu0 %399  ;;  %v380_v58 = vpop.permute.xlu1 %379 }
  0xce   : > { %649 = vmatpush.msk.msra.mxu2 %vm404_vm0, %v400_v48  ;;  %v384_v1 = vsel %vm383_vm2, %v705_v57, %v380_v58  ;;  %v385_v5 = vsel %vm383_vm2, %v380_v58, %v704_v46 }
  0xcf   : > { %v414_v14 = vsel %vm404_vm0, %v365_v4, %v384_v1  ;;  %v415_v15 = vsel %vm404_vm0, %v366_v13, %v385_v5 }
  0xd0   : > { %480 = vmatpush.msra.mxu2 %v416_v53 }
  0xd2   : > { %481 = vmatpush.msra.mxu2 %v413_v59 }
  0xd4   : > { %482 = vmatpush.msra.mxu2 %v410_v61 }
  0xd5   : > { %v398_v6 = vpop.permute.xlu0 %397  ;;  %v269_v20 = vpop.permute.xlu1 %268 }
  0xd6   : > { %483 = vmatpush.msra.mxu2 %v407_v63  ;;  %v402_v10 = vsel %vm401_vm4, %v396_v56, %v398_v6  ;;  %v403_v11 = vsel %vm401_vm4, %v398_v6, %v400_v48  ;;  %v273_v26 = vsel %vm272_vm8, %v675_v21, %v269_v20  ;;  %v274_v27 = vsel %vm272_vm8, %v269_v20, %v674_v54 }
  0xd7   : > { %645 = vmatpush.msk.msra.mxu0 %vm404_vm0, %v402_v10  ;;  %647 = vmatpush.msk.msra.mxu1 %vm404_vm0, %v403_v11  ;;  %v405_v32 = vsel %vm404_vm0, %v766_v2, %v273_v26  ;;  %v406_v33 = vsel %vm404_vm0, %v768_v3, %v274_v27  ;;  %v490_v3 = vperm.slane %v488_v34, 0 }
  0xd8   : > { %650 = vmatmul.msk.f32.vlgmr.msra.gmra.mxu2 %vm418_vm6, %v417_v7 }
  0xd9   : > { %440 = vmatpush.msra.mxu0 %v414_v14  ;;  %460 = vmatpush.msra.mxu1 %v415_v15 }
  0xdb   : > { %441 = vmatpush.msra.mxu0 %v411_v17  ;;  %461 = vmatpush.msra.mxu1 %v412_v18 }
  0xdd   : > { %v306_v25 = vpop.permute.xlu0 %305 }
  0xde   : > { %v310_v28 = vsel %vm309_vm9, %v685_v22, %v306_v25  ;;  %v311_v29 = vsel %vm309_vm9, %v306_v25, %v684_v49 }
  0xdf   : > { %v408_v30 = vsel %vm404_vm0, %v291_v23, %v310_v28  ;;  %v409_v31 = vsel %vm404_vm0, %v292_v24, %v311_v29 }
  0xe0   : > { %442 = vmatpush.msra.mxu0 %v408_v30  ;;  %462 = vmatpush.msra.mxu1 %v409_v31 }
  0xe2   : > { %443 = vmatpush.msra.mxu0 %v405_v32  ;;  %463 = vmatpush.msra.mxu1 %v406_v33 }
  0xe3   : > { %646 = vmatmul.msk.f32.vlgmr.msra.gmra.mxu0 %vm418_vm6, %v417_v7  ;;  %648 = vmatmul.msk.f32.vlgmr.msra.gmra.mxu1 %vm418_vm6, %v417_v7 }
 0x15b   : > { %v485_v2 = vpop.f32.mrf.mxu2 }
 0x15c   : > { %v498_v36 = vmul.f32 %v492_v35, %v485_v2 }
 0x15e   : > { %502 = vst.msk [vmem:[%s237_s14 + $0x10] sm:$0xff] %vm501_vm10, %v498_v36  ;;  %v512_v40 = vmul.f32 %v498_v36, %v498_v36  ;;  %v504_v43 = vsel %vm501_vm10, %v498_v36, 0.0 }
 0x160   : > { %v445_v38 = vpop.f32.mrf.mxu0  ;;  %v465_v39 = vpop.f32.mrf.mxu1  ;;  %v514_v47 = vsel %vm501_vm10, %v512_v40, 0.0 }
 0x161   : > { %v496_v41 = vmul.f32 %v490_v3, %v445_v38  ;;  %v497_v42 = vmul.f32 %v491_v37, %v465_v39 }
 0x163   : > { %499 = vst [vmem:[%s237_s14] sm:$0xff] %v496_v41  ;;  %v510_v44 = vmul.f32 %v496_v41, %v496_v41  ;;  %v511_v45 = vmul.f32 %v497_v42, %v497_v42  ;;  %v503_v46 = vadd.f32 %v497_v42, %v496_v41 }
 0x164   : > { %500 = vst [vmem:[%s237_s14 + $0x8] sm:$0xff] %v497_v42 }
 0x165   : > { %v505_v48 = vadd.f32 %v504_v43, %v503_v46  ;;  %v513_v49 = vadd.f32 %v511_v45, %v510_v44 }
 0x167   : > { %506 = vadd.xlane.f32.xlu2 %v505_v48  ;;  %v515_v50 = vadd.f32 %v514_v47, %v513_v49 }
 0x169   : > { %516 = vadd.xlane.f32.xlu0 %v515_v50 }
 0x1da   : > { %v507_v51 = vpop.xlane.xlu2 %506 }
 0x1db   : > { %509 = vst.msk [vmem:[%s241_s20] sm:$0xff] %vm508_vm11, %v507_v51 }
 0x1dc   : > { %v517_v52 = vpop.xlane.xlu0 %516 }
 0x1dd   : > { %518 = vst.msk [vmem:[%s245_s23] sm:$0xff] %vm508_vm11, %v517_v52 }
 0x1de PF: > { %s16_s18 = sadd.s32 1, %s712_s18  }
 0x1df   : > { %p13_p4 = scmp.ge.s32.totalorder %s16_s18, 4  }
 0x1e1   :  { %15 = sbr.rel (!%p13_p4) target bundleno = 1 (0x1), region = 99 }

</bundles_post_ra>
